<compile_context>
chip_gen: v7x
topology: tpu7x:2x2x1
jax: 0.10.0
libtpu: 0.0.40
codegen_flags: <defaults>
</compile_context>

<pallas_src>
import functools

import jax
import jax.numpy as jnp
from jax.experimental import pallas as pl
from jax.experimental.pallas import tpu as pltpu


def _mlp_kernel(xT_ref, w_in_ref, b_in_ref, w_h_ref, b_h_ref, w_outT_ref,
                b_out_ref, o_ref, *, depth, compute_dtype):
    # xT_ref:    (IN, TN)          w_in_ref:  (H, IN)      b_in_ref:  (H, 1)
    # w_h_ref:   (depth, H, H)     b_h_ref:   (depth, H, 1)
    # w_outT_ref:(H, OUT)          b_out_ref: (OUT, 1)     o_ref:     (OUT, TN)
    cd = compute_dtype
    xT = xT_ref[...]                              # (IN, TN), batch on lanes
    w_in = w_in_ref[...]                          # (H, IN)
    in_size = w_in.shape[1]

    # Input layer: K = in_size (=2) is far too small for the MXU; do it as
    # in_size broadcast multiply-adds on the VPU (outer products), lane-dense.
    h = w_in[:, 0:1] * xT[0:1, :]
    for k in range(1, in_size):
        h = h + w_in[:, k:k + 1] * xT[k:k + 1, :]
    h = jnp.tanh((h + b_in_ref[...]).astype(cd))  # (H, TN)

    # Hidden layers on the MXU: (H,H) @ (H,TN) -> (H,TN); f32 accumulation,
    # tanh in compute_dtype (bf16 hits the EUP/VPU bf16 path on v6e / v7x).
    for i in range(depth):
        z = jnp.dot(w_h_ref[i].astype(cd), h,
                    preferred_element_type=jnp.float32)
        h = jnp.tanh((z + b_h_ref[i]).astype(cd))

    # Output layer (no activation); always accumulated in f32.
    h = h.astype(jnp.float32)
    w_outT = w_outT_ref[...]                      # (H, OUT)
    out_size = w_outT.shape[1]
    if out_size == 1:
        # M=1: VPU multiply + XLU cross-sublane reduce beats a padded MXU
        # matmul (8-sublane LHS pad + result-FIFO round trip for one row).
        y = jnp.sum(w_outT * h, axis=0, keepdims=True)        # (1, TN)
    else:
        y = jax.lax.dot_general(w_outT, h, (((0,), (0,)), ((), ())),
                                preferred_element_type=jnp.float32)
    o_ref[...] = (y + b_out_ref[...]).astype(o_ref.dtype)     # lane-dense vst


def mlp_forward(x, params, *, depth, tile_n=4096, compute_dtype=jnp.float32):
    """Fused MLP forward. x: [N, input_size] float32. Returns [N, output_size].

    compute_dtype=jnp.bfloat16 runs the tanh / hidden-matmul chain in bf16
    (faster EUP/VPU/MXU on v6e & v7x); keep the f32 default on v5e or when
    strict PINN autodiff accuracy is required.  Accumulation stays f32.
    """
    w_in, b_in, w_h, b_h, w_out, b_out = params
    n, in_size = x.shape
    hidden = w_in.shape[0]
    out_size = w_out.shape[0]

    lanes = 128
    n_up = pl.cdiv(n, lanes) * lanes
    tile_n = max(lanes, (tile_n // lanes) * lanes)
    tile_n = min(tile_n, n_up)            # clamp: never compute on pure padding
    # v7x megacore: if the whole batch fits one tile but is still large, split
    # into two big tiles so ("parallel",) can shard across both TensorCores.
    if n_up <= tile_n and n_up >= 2 * 2048:
        tile_n = pl.cdiv(n_up // 2, lanes) * lanes
    grid_n = pl.cdiv(n_up, tile_n)
    n_pad = grid_n * tile_n

    # Pad + transpose in one fused XLA op feeding the kernel operand.  Callers
    # with very large collocation batches should keep x in (IN, N) layout
    # upstream to avoid even this copy.
    xT = jnp.pad(x, ((0, n_pad - n), (0, 0))).T               # (IN, n_pad)
    w_outT = w_out.T                                          # (H, OUT)

    kernel = functools.partial(_mlp_kernel, depth=depth,
                               compute_dtype=compute_dtype)

    flops = 2 * n_pad * (in_size * hidden + depth * hidden * hidden
                         + hidden * out_size)
    transcendentals = n_pad * hidden * (depth + 1)
    param_bytes = sum(p.size * p.dtype.itemsize
                      for p in (w_in, b_in, w_h, b_h, w_out, b_out))
    bytes_accessed = (xT.size + n_pad * out_size) * 4 + param_bytes

    out_T = pl.pallas_call(
        kernel,
        out_shape=jax.ShapeDtypeStruct((out_size, n_pad), x.dtype),
        grid_spec=pltpu.PrefetchScalarGridSpec(
            num_scalar_prefetch=0,
            grid=(grid_n,),
            in_specs=[
                pl.BlockSpec((in_size, tile_n), lambda i: (0, i)),   # x^T tile
                # Weights / biases: constant index_map -> block index never
                # changes, so the pipeline only DMAs them on the first step.
                # At ~20 KB total, keeping them VMEM-resident is the right
                # call on every generation (no per-layer streaming needed).
                pl.BlockSpec((hidden, in_size), lambda i: (0, 0)),   # W_in
                pl.BlockSpec((hidden, 1), lambda i: (0, 0)),         # b_in
                pl.BlockSpec((depth, hidden, hidden),
                             lambda i: (0, 0, 0)),                   # W_hidden
                pl.BlockSpec((depth, hidden, 1),
                             lambda i: (0, 0, 0)),                   # b_hidden
                pl.BlockSpec((hidden, out_size), lambda i: (0, 0)),  # W_out^T
                pl.BlockSpec((out_size, 1), lambda i: (0, 0)),       # b_out
            ],
            out_specs=pl.BlockSpec((out_size, tile_n), lambda i: (0, i)),
        ),
        compiler_params=pltpu.CompilerParams(
            dimension_semantics=("parallel",)),
        cost_estimate=pl.CostEstimate(flops=flops,
                                      transcendentals=transcendentals,
                                      bytes_accessed=bytes_accessed),
    )(xT, w_in, b_in, w_h, b_h, w_outT, b_out)

    return out_T[:, :n].T                                     # (N, OUT)


def init_params(key, input_size, hidden_size, output_size, depth):
    """PyTorch-style Linear init: U(-1/sqrt(fan_in), 1/sqrt(fan_in)).
    Weights stored in PyTorch [out_features, in_features] layout; biases as
    column vectors [out_features, 1] so they broadcast over lanes."""
    keys = jax.random.split(key, 2 * (depth + 2))

    def lin(kw, kb, fan_in, fan_out):
        bound = 1.0 / jnp.sqrt(jnp.asarray(fan_in, jnp.float32))
        w = jax.random.uniform(kw, (fan_out, fan_in), jnp.float32, -bound, bound)
        b = jax.random.uniform(kb, (fan_out, 1), jnp.float32, -bound, bound)
        return w, b

    w_in, b_in = lin(keys[0], keys[1], input_size, hidden_size)

    w_h_list, b_h_list = [], []
    for i in range(depth):
        w, b = lin(keys[2 + 2 * i], keys[3 + 2 * i], hidden_size, hidden_size)
        w_h_list.append(w)
        b_h_list.append(b)
    w_h = jnp.stack(w_h_list, axis=0)                         # (depth, H, H)
    b_h = jnp.stack(b_h_list, axis=0)                         # (depth, H, 1)

    w_out, b_out = lin(keys[2 + 2 * depth], keys[3 + 2 * depth],
                       hidden_size, output_size)
    return (w_in, b_in, w_h, b_h, w_out, b_out)


def mlp_reference(x, params, *, depth):
    """Pure-JAX reference of the PyTorch forward for validation."""
    w_in, b_in, w_h, b_h, w_out, b_out = params
    h = jnp.tanh(x @ w_in.T + b_in[:, 0])
    for i in range(depth):
        h = jnp.tanh(h @ w_h[i].T + b_h[i, :, 0])
    return h @ w_out.T + b_out[:, 0]


if __name__ == "__main__":
    # PINN-Burgers-style config: inputs are (x, t) pairs -> scalar u.
    input_size = 2
    hidden_size = 32
    output_size = 1
    depth = 4
    n = 256        # toy batch of collocation points -> single large-lane step

    key = jax.random.PRNGKey(0)
    k_params, k_x = jax.random.split(key)
    params = init_params(k_params, input_size, hidden_size, output_size, depth)
    x = jax.random.normal(k_x, (n, input_size), jnp.float32)

    ref = mlp_reference(x, params, depth=depth)

    # f32 path (default; required on v5e and for strict PINN autodiff accuracy).
    out = jax.block_until_ready(mlp_forward(x, params, depth=depth))
    assert out.shape == (n, output_size), out.shape
    assert jnp.allclose(out, ref, atol=5e-5, rtol=5e-5), \
        float(jnp.max(jnp.abs(out - ref)))

    # bf16 compute path (v6e / v7x EUP-bound optimization); looser tolerance.
    out_bf16 = jax.block_until_ready(
        mlp_forward(x, params, depth=depth, compute_dtype=jnp.bfloat16))
    assert out_bf16.shape == (n, output_size), out_bf16.shape
    assert jnp.allclose(out_bf16, ref, atol=5e-2, rtol=5e-2), \
        float(jnp.max(jnp.abs(out_bf16 - ref)))

    print("KERNEL_OK")
</pallas_src>

<mosaic_0001>
module attributes {stable_mosaic.version = 11 : i64} {
  func.func @_mlp_kernel(%arg0: i32, %arg1: memref<2x256xf32, #tpu.memory_space<vmem>>, %arg2: memref<32x2xf32, #tpu.memory_space<vmem>>, %arg3: memref<32x1xf32, #tpu.memory_space<vmem>>, %arg4: memref<4x32x32xf32, #tpu.memory_space<vmem>>, %arg5: memref<4x32x1xf32, #tpu.memory_space<vmem>>, %arg6: memref<32x1xf32, #tpu.memory_space<vmem>>, %arg7: memref<1x1xf32, #tpu.memory_space<vmem>>, %arg8: memref<1x256xf32, #tpu.memory_space<vmem>>) attributes {dimension_semantics = [#tpu.dimension_semantics<parallel>], iteration_bounds = array<i64: 1>, scalar_prefetch = 0 : i64, scratch_operands = 0 : i64, tpu.core_type = #tpu.core_type<tc>, window_params = [{transform_indices = @transform_0, window_bounds = array<i64: 2, 256>}, {pipeline_mode = #tpu.pipeline_mode<synchronous>, transform_indices = @transform_1, window_bounds = array<i64: 32, 2>}, {pipeline_mode = #tpu.pipeline_mode<synchronous>, transform_indices = @transform_2, window_bounds = array<i64: 32, 1>}, {pipeline_mode = #tpu.pipeline_mode<synchronous>, transform_indices = @transform_3, window_bounds = array<i64: 4, 32, 32>}, {pipeline_mode = #tpu.pipeline_mode<synchronous>, transform_indices = @transform_4, window_bounds = array<i64: 4, 32, 1>}, {pipeline_mode = #tpu.pipeline_mode<synchronous>, transform_indices = @transform_5, window_bounds = array<i64: 32, 1>}, {pipeline_mode = #tpu.pipeline_mode<synchronous>, transform_indices = @transform_6, window_bounds = array<i64: 1, 1>}, {transform_indices = @transform_7, window_bounds = array<i64: 1, 256>}]} {
    %c0 = arith.constant 0 : index
    %c0_0 = arith.constant 0 : index
    %0 = vector.load %arg1[%c0, %c0_0] : memref<2x256xf32, #tpu.memory_space<vmem>>, vector<2x256xf32>
    %c0_1 = arith.constant 0 : index
    %c0_2 = arith.constant 0 : index
    %1 = vector.load %arg2[%c0_1, %c0_2] : memref<32x2xf32, #tpu.memory_space<vmem>>, vector<32x2xf32>
    %2 = vector.extract_strided_slice %1 {offsets = [0, 0], sizes = [32, 1], strides = [1, 1]} : vector<32x2xf32> to vector<32x1xf32>
    %3 = vector.extract_strided_slice %0 {offsets = [0, 0], sizes = [1, 256], strides = [1, 1]} : vector<2x256xf32> to vector<1x256xf32>
    %4 = vector.broadcast %2 : vector<32x1xf32> to vector<32x256xf32>
    %5 = vector.broadcast %3 : vector<1x256xf32> to vector<32x256xf32>
    %6 = arith.mulf %4, %5 : vector<32x256xf32>
    %7 = vector.extract_strided_slice %1 {offsets = [0, 1], sizes = [32, 1], strides = [1, 1]} : vector<32x2xf32> to vector<32x1xf32>
    %8 = vector.extract_strided_slice %0 {offsets = [1, 0], sizes = [1, 256], strides = [1, 1]} : vector<2x256xf32> to vector<1x256xf32>
    %9 = vector.broadcast %7 : vector<32x1xf32> to vector<32x256xf32>
    %10 = vector.broadcast %8 : vector<1x256xf32> to vector<32x256xf32>
    %11 = arith.mulf %9, %10 : vector<32x256xf32>
    %12 = arith.addf %6, %11 : vector<32x256xf32>
    %c0_3 = arith.constant 0 : index
    %c0_4 = arith.constant 0 : index
    %13 = vector.load %arg3[%c0_3, %c0_4] : memref<32x1xf32, #tpu.memory_space<vmem>>, vector<32x1xf32>
    %14 = vector.broadcast %13 : vector<32x1xf32> to vector<32x256xf32>
    %15 = arith.addf %12, %14 : vector<32x256xf32>
    %16 = math.tanh %15 : vector<32x256xf32>
    %c0_5 = arith.constant 0 : index
    %c0_6 = arith.constant 0 : index
    %c0_7 = arith.constant 0 : index
    %17 = vector.load %arg4[%c0_5, %c0_6, %c0_7] : memref<4x32x32xf32, #tpu.memory_space<vmem>>, vector<1x32x32xf32>
    %18 = vector.shape_cast %17 : vector<1x32x32xf32> to vector<32x32xf32>
    %cst = arith.constant dense<0.000000e+00> : vector<32x256xf32>
    %19 = tpu.matmul %18, %16, %cst {dimension_numbers = #tpu.dot_dimension_numbers<[1], [0], [0], [1], [0, 0, 1, 1], [], []>} : vector<32x32xf32>, vector<32x256xf32>, vector<32x256xf32> -> vector<32x256xf32>
    %c0_8 = arith.constant 0 : index
    %c0_9 = arith.constant 0 : index
    %c0_10 = arith.constant 0 : index
    %20 = vector.load %arg5[%c0_8, %c0_9, %c0_10] : memref<4x32x1xf32, #tpu.memory_space<vmem>>, vector<1x32x1xf32>
    %21 = vector.shape_cast %20 : vector<1x32x1xf32> to vector<32x1xf32>
    %22 = vector.broadcast %21 : vector<32x1xf32> to vector<32x256xf32>
    %23 = arith.addf %19, %22 : vector<32x256xf32>
    %24 = math.tanh %23 : vector<32x256xf32>
    %c1 = arith.constant 1 : index
    %c0_11 = arith.constant 0 : index
    %c0_12 = arith.constant 0 : index
    %25 = vector.load %arg4[%c1, %c0_11, %c0_12] : memref<4x32x32xf32, #tpu.memory_space<vmem>>, vector<1x32x32xf32>
    %26 = vector.shape_cast %25 : vector<1x32x32xf32> to vector<32x32xf32>
    %cst_13 = arith.constant dense<0.000000e+00> : vector<32x256xf32>
    %27 = tpu.matmul %26, %24, %cst_13 {dimension_numbers = #tpu.dot_dimension_numbers<[1], [0], [0], [1], [0, 0, 1, 1], [], []>} : vector<32x32xf32>, vector<32x256xf32>, vector<32x256xf32> -> vector<32x256xf32>
    %c1_14 = arith.constant 1 : index
    %c0_15 = arith.constant 0 : index
    %c0_16 = arith.constant 0 : index
    %28 = vector.load %arg5[%c1_14, %c0_15, %c0_16] : memref<4x32x1xf32, #tpu.memory_space<vmem>>, vector<1x32x1xf32>
    %29 = vector.shape_cast %28 : vector<1x32x1xf32> to vector<32x1xf32>
    %30 = vector.broadcast %29 : vector<32x1xf32> to vector<32x256xf32>
    %31 = arith.addf %27, %30 : vector<32x256xf32>
    %32 = math.tanh %31 : vector<32x256xf32>
    %c2 = arith.constant 2 : index
    %c0_17 = arith.constant 0 : index
    %c0_18 = arith.constant 0 : index
    %33 = vector.load %arg4[%c2, %c0_17, %c0_18] : memref<4x32x32xf32, #tpu.memory_space<vmem>>, vector<1x32x32xf32>
    %34 = vector.shape_cast %33 : vector<1x32x32xf32> to vector<32x32xf32>
    %cst_19 = arith.constant dense<0.000000e+00> : vector<32x256xf32>
    %35 = tpu.matmul %34, %32, %cst_19 {dimension_numbers = #tpu.dot_dimension_numbers<[1], [0], [0], [1], [0, 0, 1, 1], [], []>} : vector<32x32xf32>, vector<32x256xf32>, vector<32x256xf32> -> vector<32x256xf32>
    %c2_20 = arith.constant 2 : index
    %c0_21 = arith.constant 0 : index
    %c0_22 = arith.constant 0 : index
    %36 = vector.load %arg5[%c2_20, %c0_21, %c0_22] : memref<4x32x1xf32, #tpu.memory_space<vmem>>, vector<1x32x1xf32>
    %37 = vector.shape_cast %36 : vector<1x32x1xf32> to vector<32x1xf32>
    %38 = vector.broadcast %37 : vector<32x1xf32> to vector<32x256xf32>
    %39 = arith.addf %35, %38 : vector<32x256xf32>
    %40 = math.tanh %39 : vector<32x256xf32>
    %c3 = arith.constant 3 : index
    %c0_23 = arith.constant 0 : index
    %c0_24 = arith.constant 0 : index
    %41 = vector.load %arg4[%c3, %c0_23, %c0_24] : memref<4x32x32xf32, #tpu.memory_space<vmem>>, vector<1x32x32xf32>
    %42 = vector.shape_cast %41 : vector<1x32x32xf32> to vector<32x32xf32>
    %cst_25 = arith.constant dense<0.000000e+00> : vector<32x256xf32>
    %43 = tpu.matmul %42, %40, %cst_25 {dimension_numbers = #tpu.dot_dimension_numbers<[1], [0], [0], [1], [0, 0, 1, 1], [], []>} : vector<32x32xf32>, vector<32x256xf32>, vector<32x256xf32> -> vector<32x256xf32>
    %c3_26 = arith.constant 3 : index
    %c0_27 = arith.constant 0 : index
    %c0_28 = arith.constant 0 : index
    %44 = vector.load %arg5[%c3_26, %c0_27, %c0_28] : memref<4x32x1xf32, #tpu.memory_space<vmem>>, vector<1x32x1xf32>
    %45 = vector.shape_cast %44 : vector<1x32x1xf32> to vector<32x1xf32>
    %46 = vector.broadcast %45 : vector<32x1xf32> to vector<32x256xf32>
    %47 = arith.addf %43, %46 : vector<32x256xf32>
    %48 = math.tanh %47 : vector<32x256xf32>
    %c0_29 = arith.constant 0 : index
    %c0_30 = arith.constant 0 : index
    %49 = vector.load %arg6[%c0_29, %c0_30] : memref<32x1xf32, #tpu.memory_space<vmem>>, vector<32x1xf32>
    %50 = vector.broadcast %49 : vector<32x1xf32> to vector<32x256xf32>
    %51 = arith.mulf %50, %48 : vector<32x256xf32>
    %cst_31 = arith.constant dense<0.000000e+00> : vector<256xf32>
    %52 = vector.multi_reduction <add>, %51, %cst_31 [0] : vector<32x256xf32> to vector<256xf32>
    %53 = vector.shape_cast %52 : vector<256xf32> to vector<1x256xf32>
    %c0_32 = arith.constant 0 : index
    %c0_33 = arith.constant 0 : index
    %54 = vector.load %arg7[%c0_32, %c0_33] : memref<1x1xf32, #tpu.memory_space<vmem>>, vector<1x1xf32>
    %55 = vector.broadcast %54 : vector<1x1xf32> to vector<1x256xf32>
    %56 = arith.addf %53, %55 : vector<1x256xf32>
    %c0_34 = arith.constant 0 : index
    %c0_35 = arith.constant 0 : index
    %57 = vector.load %arg8[%c0_34, %c0_35] : memref<1x256xf32, #tpu.memory_space<vmem>>, vector<1x256xf32>
    tpu.vector_store %arg8[%c0_34, %c0_35], %56 {strides = array<i32>} : memref<1x256xf32, #tpu.memory_space<vmem>>, vector<1x256xf32>,
    return
  }
  func.func @transform_0(%arg0: i32) -> (i32, i32) {
    %c0_i32 = arith.constant 0 : i32
    %c0_i32_0 = arith.constant 0 : i32
    return %c0_i32, %arg0 : i32, i32
  }
  func.func @transform_1(%arg0: i32) -> (i32, i32) {
    %c0_i32 = arith.constant 0 : i32
    %c0_i32_0 = arith.constant 0 : i32
    %c0_i32_1 = arith.constant 0 : i32
    return %c0_i32, %c0_i32_0 : i32, i32
  }
  func.func @transform_2(%arg0: i32) -> (i32, i32) {
    %c0_i32 = arith.constant 0 : i32
    %c0_i32_0 = arith.constant 0 : i32
    %c0_i32_1 = arith.constant 0 : i32
    return %c0_i32, %c0_i32_0 : i32, i32
  }
  func.func @transform_3(%arg0: i32) -> (i32, i32, i32) {
    %c0_i32 = arith.constant 0 : i32
    %c0_i32_0 = arith.constant 0 : i32
    %c0_i32_1 = arith.constant 0 : i32
    %c0_i32_2 = arith.constant 0 : i32
    return %c0_i32, %c0_i32_0, %c0_i32_1 : i32, i32, i32
  }
  func.func @transform_4(%arg0: i32) -> (i32, i32, i32) {
    %c0_i32 = arith.constant 0 : i32
    %c0_i32_0 = arith.constant 0 : i32
    %c0_i32_1 = arith.constant 0 : i32
    %c0_i32_2 = arith.constant 0 : i32
    return %c0_i32, %c0_i32_0, %c0_i32_1 : i32, i32, i32
  }
  func.func @transform_5(%arg0: i32) -> (i32, i32) {
    %c0_i32 = arith.constant 0 : i32
    %c0_i32_0 = arith.constant 0 : i32
    %c0_i32_1 = arith.constant 0 : i32
    return %c0_i32, %c0_i32_0 : i32, i32
  }
  func.func @transform_6(%arg0: i32) -> (i32, i32) {
    %c0_i32 = arith.constant 0 : i32
    %c0_i32_0 = arith.constant 0 : i32
    %c0_i32_1 = arith.constant 0 : i32
    return %c0_i32, %c0_i32_0 : i32, i32
  }
  func.func @transform_7(%arg0: i32) -> (i32, i32) {
    %c0_i32 = arith.constant 0 : i32
    %c0_i32_0 = arith.constant 0 : i32
    return %c0_i32, %arg0 : i32, i32
  }
}

</mosaic_0001>

<bundles_post_ra>
// kernel: tpu_custom_call.1
= control target key start
LH: loop header
LB: loop body
LE: loop exit
PB: predicated region body
PF: predicated region fallthrough
CT: control target
= control target key end

     0   :  { %s1254_s0 = inlined_call_operand.vmem [shape: f32[2,256], index: 0, kind: input, shape index: {}]   ;;  %s1255_s1 = inlined_call_operand.vmem [shape: f32[32,2], index: 1, kind: input, shape index: {}]   ;;  %s1256_s2 = inlined_call_operand.vmem [shape: f32[32,1], index: 2, kind: input, shape index: {}]   ;;  %s1257_s3 = inlined_call_operand.vmem [shape: f32[4,32,32], index: 3, kind: input, shape index: {}]   ;;  %s1258_s4 = inlined_call_operand.vmem [shape: f32[4,32,1], index: 4, kind: input, shape index: {}]   ;;  %s1259_s5 = inlined_call_operand.vmem [shape: f32[32,1], index: 5, kind: input, shape index: {}]   ;;  %s1260_s6 = inlined_call_operand.<no memory space> [shape: f32[1,1], index: 6, kind: input, shape index: {}]   ;;  %s1261_s7 = inlined_call_operand.hbm [shape: f32[1,256], index: 7, kind: output, shape index: {}]  }
   0x1   :  { %v12_v0 = vstv %s1260_s6 }
   0x2   :  { %13 = vst [vmem:[#allocation2] sm:$0x1] %v12_v0 }
   0x3   :  { %v32_v1 = vld [vmem:[%s1255_s1 + $0x10] sm:$0xff]  ;;  %v30_v2 = vld [vmem:[%s1255_s1] sm:$0xff]  ;;  %v1012_v3 = vmov 1   ;;  %v31_v4 = vld [vmem:[%s1255_s1 + $0x8] sm:$0xff]  ;;  %v1013_v5 = vmov 0  }
   0x4   :  { %904 = vset.pattern.permute.xlu0 %v1012_v3  ;;  %902 = vset.pattern.permute.xlu1 %v1012_v3  ;;  %v33_v6 = vld [vmem:[%s1255_s1 + $0x18] sm:$0xff] }
   0x5   :  { %90 = vperm.xlu0 %904, %v32_v1   ;;  %82 = vperm.xlu1 %902, %v30_v2  }
   0x9   :  { %905 = vset.pattern.permute.xlu0 %v1013_v5  ;;  %86 = vperm.xlu1 %902, %v31_v4  }
   0xa   :  { %36 = vperm.xlu0 %905, %v30_v2  }
   0xd   :  { %903 = vset.pattern.permute.xlu1 %v1013_v5 }
   0xe   :  { %14 = vsyncpa [#allocation4], 0  ;;  %41 = vperm.xlu0 %905, %v31_v4   ;;  %51 = vperm.xlu1 %903, %v33_v6   ;;  %v132_v7 = vld [vmem:[%s1256_s2 + $0x8] sm:$0xff]  ;;  %v131_v8 = vld [vmem:[%s1256_s2] sm:$0xff]  ;;  %v1014_v23 = vmov 0.0   ;;  %v55_v33 = vlaneseq  ;;  %vm199_vm0 = vcmask 261120  }
   0xf   :  { %v175_v9 = vld [vmem:[%s1258_s4] sm:$0xff]  ;;  %v133_v10 = vld [vmem:[%s1256_s2 + $0x10] sm:$0xff]  ;;  %v134_v12 = vld [vmem:[%s1256_s2 + $0x18] sm:$0xff]  ;;  %276 = vmatprep.mubr.f32.mxu0 %v1014_v23  ;;  %415 = vmatprep.mubr.f32.mxu1 %v1014_v23 }
  0x10   :  { %v177_v11 = vld [vmem:[%s1258_s4 + $0x10] sm:$0xff]  ;;  %v833_v13 = vld [vmem:[%s1258_s4 + $0x20] sm:$0xff]  ;;  %v176_v14 = vld [vmem:[%s1258_s4 + $0x8] sm:$0xff]  ;;  %v1147_v34 = vshrl.u32 %v55_v33, 7  ;;  %vm808_vm1 = vcmp.lt.s32.totalorder %v55_v33, 256 }
  0x11   :  { %v835_v15 = vld [vmem:[%s1258_s4 + $0x30] sm:$0xff]  ;;  %v178_v16 = vld [vmem:[%s1258_s4 + $0x18] sm:$0xff]  ;;  %v845_v17 = vld [vmem:[%s1258_s4 + $0x40] sm:$0xff] }
  0x12   :  { %46 = vperm.xlu0 %905, %v32_v1   ;;  %906 = vset.pattern.permute.xlu1 %v1012_v3  ;;  %v834_v18 = vld [vmem:[%s1258_s4 + $0x28] sm:$0xff]  ;;  %v847_v19 = vld [vmem:[%s1258_s4 + $0x50] sm:$0xff]  ;;  %v836_v20 = vld [vmem:[%s1258_s4 + $0x38] sm:$0xff]  ;;  %v1150_v37 = vsub.s32 0, %v1147_v34  ;;  %v61_v38 = vsub.s32 2, %v1147_v34  ;;  %v99_v39 = vsub.s32 1, %v1147_v34 }
  0x13   :  { %94 = vperm.xlu1 %906, %v33_v6   ;;  %v857_v21 = vld [vmem:[%s1258_s4 + $0x60] sm:$0xff]  ;;  %v846_v22 = vld [vmem:[%s1258_s4 + $0x48] sm:$0xff]  ;;  %v859_v24 = vld [vmem:[%s1258_s4 + $0x70] sm:$0xff]  ;;  %v103_v40 = vsub.s32 3, %v1147_v34 }
  0x14   :  { %v848_v25 = vld [vmem:[%s1258_s4 + $0x58] sm:$0xff]  ;;  %v726_v26 = vld [vmem:[%s1259_s5] sm:$0xff]  ;;  %v858_v27 = vld [vmem:[%s1258_s4 + $0x68] sm:$0xff] }
  0x15   :  { %v728_v28 = vld [vmem:[%s1259_s5 + $0x10] sm:$0xff]  ;;  %v860_v29 = vld [vmem:[%s1258_s4 + $0x78] sm:$0xff]  ;;  %v776_v30 = vld [vmem:[#allocation2] sm:$0x1] }
  0x16   :  { %142 = vperm.xlu0 %905, %v132_v7   ;;  %v727_v31 = vld [vmem:[%s1259_s5 + $0x8] sm:$0xff]  ;;  %v729_v32 = vld [vmem:[%s1259_s5 + $0x18] sm:$0xff]  ;;  %v29_v41 = vld [vmem:[%s1254_s0] sm:$0xf] }
  0x17   :  { %907 = vset.pattern.permute.xlu1 %v1013_v5  ;;  %v58_v44 = vrot.slane %v29_v41, %v1150_v37  ;;  %v62_v45 = vrot.slane %v29_v41, %v61_v38  ;;  %v100_v46 = vrot.slane %v29_v41, %v99_v39  ;;  %v104_v47 = vrot.slane %v29_v41, %v103_v40 }
  0x18   :  { %137 = vperm.xlu1 %907, %v131_v8  }
  0x19   :  { %v68_v48 = vrot.slane %v58_v44, %v1150_v37  ;;  %v72_v51 = vrot.slane %v62_v45, %v1150_v37  ;;  %v110_v52 = vrot.slane %v100_v46, %v99_v39  ;;  %v114_v53 = vrot.slane %v104_v47, %v99_v39  ;;  %v171_v44 = vld [vmem:[%s1257_s3] sm:$0xff]  ;;  %v172_v45 = vld [vmem:[%s1257_s3 + $0x8] sm:$0xff]  ;;  %v173_v46 = vld [vmem:[%s1257_s3 + $0x10] sm:$0xff] }
  0x1a   :  { %181 = vperm.xlu0 %905, %v175_v9   ;;  %v174_v47 = vld [vmem:[%s1257_s3 + $0x18] sm:$0xff] }
  0x1c   :  { %147 = vperm.xlu1 %907, %v133_v10  }
  0x1e   :  { %191 = vperm.xlu0 %905, %v177_v11  }
  0x20   :  { %152 = vperm.xlu1 %907, %v134_v12  }
  0x22   :  { %321 = vperm.xlu0 %905, %v833_v13  }
  0x24   :  { %186 = vperm.xlu1 %907, %v176_v14  }
  0x26   :  { %331 = vperm.xlu0 %905, %v835_v15  }
  0x28   :  { %196 = vperm.xlu1 %907, %v178_v16  }
  0x2a   :  { %460 = vperm.xlu0 %905, %v845_v17  }
  0x2c   :  { %326 = vperm.xlu1 %907, %v834_v18  }
  0x2e   :  { %470 = vperm.xlu0 %905, %v847_v19  }
  0x30   :  { %336 = vperm.xlu1 %907, %v836_v20  }
  0x32   :  { %599 = vperm.xlu0 %905, %v857_v21  }
  0x34   :  { %465 = vperm.xlu1 %907, %v846_v22  }
  0x36   :  { %609 = vperm.xlu0 %905, %v859_v24  }
  0x38   :  { %475 = vperm.xlu1 %907, %v848_v25  }
  0x3a   :  { %732 = vperm.xlu0 %905, %v726_v26  }
  0x3c   :  { %604 = vperm.xlu1 %907, %v858_v27  }
  0x3e   :  { %742 = vperm.xlu0 %905, %v728_v28  }
  0x40   :  { %614 = vperm.xlu1 %907, %v860_v29  }
  0x42   :  { %779 = vperm.xlu0 %905, %v776_v30  }
  0x44   :  { %737 = vperm.xlu1 %907, %v727_v31  }
  0x48   :  { %747 = vperm.xlu1 %907, %v729_v32  }
  0x84   :  { %v83_v35 = vpop.permute.xlu1 %82  ;;  %v91_v36 = vpop.permute.xlu0 %90 }
  0x85   :  { %v115_v62 = vmul.f32 %v110_v52, %v83_v35  ;;  %v116_v63 = vmul.f32 %v114_v53, %v83_v35  ;;  %v119_v10 = vmul.f32 %v110_v52, %v91_v36  ;;  %v120_v13 = vmul.f32 %v114_v53, %v91_v36 }
  0x88   :  { %v87_v42 = vpop.permute.xlu1 %86 }
  0x89   :  { %v37_v43 = vpop.permute.xlu0 %36  ;;  %v117_v58 = vmul.f32 %v110_v52, %v87_v42  ;;  %v118_v59 = vmul.f32 %v114_v53, %v87_v42 }
  0x8a   :  { %v73_v56 = vmul.f32 %v68_v48, %v37_v43  ;;  %v74_v60 = vmul.f32 %v72_v51, %v37_v43 }
  0x8c   :  { %v123_v3 = vadd.f32 %v115_v62, %v73_v56  ;;  %v124_v7 = vadd.f32 %v116_v63, %v74_v60 }
  0x8d   :  { %v42_v49 = vpop.permute.xlu0 %41  ;;  %v52_v50 = vpop.permute.xlu1 %51 }
  0x8e   :  { %v75_v54 = vmul.f32 %v68_v48, %v42_v49  ;;  %v76_v55 = vmul.f32 %v72_v51, %v42_v49  ;;  %v79_v19 = vmul.f32 %v68_v48, %v52_v50  ;;  %v80_v20 = vmul.f32 %v72_v51, %v52_v50 }
  0x90   :  { %v125_v0 = vadd.f32 %v117_v58, %v75_v54  ;;  %v126_v1 = vadd.f32 %v118_v59, %v76_v55 }
  0x91   :  { %v47_v57 = vpop.permute.xlu0 %46 }
  0x92   :  { %v95_v61 = vpop.permute.xlu1 %94  ;;  %v77_v4 = vmul.f32 %v68_v48, %v47_v57  ;;  %v78_v8 = vmul.f32 %v72_v51, %v47_v57 }
  0x93   :  { %v121_v14 = vmul.f32 %v110_v52, %v95_v61  ;;  %v122_v15 = vmul.f32 %v114_v53, %v95_v61 }
  0x94   :  { %v127_v16 = vadd.f32 %v119_v10, %v77_v4  ;;  %v128_v18 = vadd.f32 %v120_v13, %v78_v8 }
  0x95   :  { %v143_v2 = vpop.permute.xlu0 %142  ;;  %v129_v24 = vadd.f32 %v121_v14, %v79_v19  ;;  %v130_v25 = vadd.f32 %v122_v15, %v80_v20  ;;  %v832_v19 = vld [vmem:[%s1257_s3 + $0x38] sm:$0xff] }
  0x96   :  { %v157_v5 = vadd.f32 %v143_v2, %v125_v0  ;;  %v158_v6 = vadd.f32 %v143_v2, %v126_v1 }
  0x97   :  { %v138_v9 = vpop.permute.xlu1 %137 }
  0x98   :  { %908 = vtanh.f32 %v157_v5  ;;  %v155_v11 = vadd.f32 %v138_v9, %v123_v3  ;;  %v156_v12 = vadd.f32 %v138_v9, %v124_v7 }
  0x99   :  { %910 = vtanh.f32 %v158_v6  ;;  %v182_v48 = vpop.permute.xlu0 %181 }
  0x9a   :  { %912 = vtanh.f32 %v155_v11 }
  0x9b   :  { %914 = vtanh.f32 %v156_v12  ;;  %v148_v17 = vpop.permute.xlu1 %147 }
  0x9c   :  { %v159_v21 = vadd.f32 %v148_v17, %v127_v16  ;;  %v160_v22 = vadd.f32 %v148_v17, %v128_v18  ;;  %v829_v16 = vld [vmem:[%s1257_s3 + $0x20] sm:$0xff]  ;;  %v830_v17 = vld [vmem:[%s1257_s3 + $0x28] sm:$0xff]  ;;  %v831_v18 = vld [vmem:[%s1257_s3 + $0x30] sm:$0xff] }
  0x9d   :  { %v192_v58 = vpop.permute.xlu0 %191 }
  0x9e   :  { %916 = vtanh.f32 %v159_v21 }
  0x9f   :  { %v153_v26 = vpop.permute.xlu1 %152  ;;  %918 = vtanh.f32 %v160_v22 }
  0xa0   :  { %v161_v27 = vadd.f32 %v153_v26, %v129_v24  ;;  %v162_v28 = vadd.f32 %v153_v26, %v130_v25 }
  0xa1   :  { %v322_v20 = vpop.permute.xlu0 %321 }
  0xa2   :  { %v909_v29 = vpop.eup %908  ;;  %920 = vtanh.f32 %v161_v27 }
  0xa3   :  { %v911_v30 = vpop.eup %910  ;;  %922 = vtanh.f32 %v162_v28  ;;  %v187_v53 = vpop.permute.xlu1 %186 }
  0xa4   :  { %v913_v31 = vpop.eup %912 }
  0xa5   :  { %v915_v32 = vpop.eup %914  ;;  %v867_v35 = vpack.c.bf16 %v909_v29, %v913_v31  ;;  %v332_v31 = vpop.permute.xlu0 %331 }
  0xa6   :  { %v865_v36 = vpack.c.bf16 %v911_v30, %v915_v32 }
  0xa7   :  { %v197_v63 = vpop.permute.xlu1 %196 }
  0xa8   :  { %866 = vmatprep.subr.bf16.mxu0 %v865_v36  ;;  %v917_v38 = vpop.eup %916 }
  0xa9   :  { %868 = vmatpush1.bf16.msra.mxu0 %v867_v35  ;;  %v919_v39 = vpop.eup %918 }
  0xab   :  { %v327_v26 = vpop.permute.xlu1 %326 }
  0xac   :  { %v921_v40 = vpop.eup %920 }
  0xad   :  { %v923_v41 = vpop.eup %922  ;;  %v871_v42 = vpack.c.bf16 %v921_v40, %v917_v38 }
  0xae   :  { %v869_v43 = vpack.c.bf16 %v923_v41, %v919_v39 }
  0xaf   :  { %v337_v39 = vpop.permute.xlu1 %336 }
  0xb0   :  { %870 = vmatprep.subr.bf16.mxu0 %v869_v43 }
  0xb1   :  { %872 = vmatpush1.bf16.msra.mxu0 %v871_v42 }
  0xb4   :  { %825 = vmatmul.mubr.msk.f32.vlgmr.msra.gmra.mrb[0].mxu0 %vm199_vm0, %v171_v44 }
  0xb5   :  { %282 = vmatprep.mubr.f32.mxu0 %v1014_v23 }
  0xb8   :  { %826 = vmatmul.mubr.msk.f32.gmra.mrb[2].mxu0 %vm199_vm0, %v172_v45 }
  0xb9   :  { %288 = vmatprep.mubr.f32.mxu0 %v1014_v23 }
  0xbc   :  { %827 = vmatmul.mubr.msk.f32.gmra.mrb[4].mxu0 %vm199_vm0, %v173_v46 }
  0xbd   :  { %294 = vmatprep.mubr.f32.mxu0 %v1014_v23 }
  0xc0   :  { %828 = vmatmul.mubr.msk.f32.gmra.mrb[6].mxu0 %vm199_vm0, %v174_v47 }
  0xc1   :  { %554 = vmatprep.mubr.f32.mxu0 %v1014_v23 }
 0x187   :  { %v278_v49 = vpop.f32.mrb[0].mxu0 }
 0x188   :  { %v279_v50 = vadd.f32 %v278_v49, %v182_v48  ;;  %v280_v51 = vpop.f32.mrb[1].mxu0 }
 0x189   :  { %v281_v52 = vadd.f32 %v280_v51, %v182_v48 }
 0x18a   :  { %924 = vtanh.f32 %v279_v50 }
 0x18b   :  { %v284_v54 = vpop.f32.mrb[2].mxu0  ;;  %926 = vtanh.f32 %v281_v52 }
 0x18c   :  { %v285_v55 = vadd.f32 %v284_v54, %v187_v53  ;;  %v286_v56 = vpop.f32.mrb[3].mxu0 }
 0x18d   :  { %v287_v57 = vadd.f32 %v286_v56, %v187_v53  ;;  %v841_v56 = vld [vmem:[%s1257_s3 + $0x40] sm:$0xff] }
 0x18e   :  { %928 = vtanh.f32 %v285_v55 }
 0x18f   :  { %930 = vtanh.f32 %v287_v57  ;;  %v290_v59 = vpop.f32.mrb[4].mxu0  ;;  %v842_v57 = vld [vmem:[%s1257_s3 + $0x48] sm:$0xff] }
 0x190   :  { %v291_v60 = vadd.f32 %v290_v59, %v192_v58  ;;  %v292_v61 = vpop.f32.mrb[5].mxu0  ;;  %v844_v59 = vld [vmem:[%s1257_s3 + $0x58] sm:$0xff] }
 0x191   :  { %v293_v62 = vadd.f32 %v292_v61, %v192_v58  ;;  %v843_v58 = vld [vmem:[%s1257_s3 + $0x50] sm:$0xff] }
 0x192   :  { %932 = vtanh.f32 %v291_v60  ;;  %v461_v60 = vpop.permute.xlu0 %460 }
 0x193   :  { %v296_v0 = vpop.f32.mrb[6].mxu0  ;;  %934 = vtanh.f32 %v293_v62 }
 0x194   :  { %v297_v1 = vadd.f32 %v296_v0, %v197_v63  ;;  %v298_v2 = vpop.f32.mrb[7].mxu0  ;;  %v925_v4 = vpop.eup %924 }
 0x195   :  { %v299_v3 = vadd.f32 %v298_v2, %v197_v63  ;;  %v927_v5 = vpop.eup %926 }
 0x196   :  { %936 = vtanh.f32 %v297_v1  ;;  %v466_v1 = vpop.permute.xlu1 %465 }
 0x197   :  { %938 = vtanh.f32 %v299_v3 }
 0x198   :  { %v929_v6 = vpop.eup %928 }
 0x199   :  { %v931_v7 = vpop.eup %930  ;;  %v875_v8 = vpack.c.bf16 %v929_v6, %v925_v4  ;;  %v471_v6 = vpop.permute.xlu0 %470 }
 0x19a   :  { %v873_v9 = vpack.c.bf16 %v931_v7, %v927_v5 }
 0x19c   :  { %874 = vmatprep.subr.bf16.mxu1 %v873_v9  ;;  %v933_v10 = vpop.eup %932 }
 0x19d   :  { %876 = vmatpush1.bf16.msra.mxu1 %v875_v8  ;;  %v935_v11 = vpop.eup %934 }
 0x1a0   :  { %v937_v12 = vpop.eup %936 }
 0x1a1   :  { %v939_v13 = vpop.eup %938  ;;  %v879_v14 = vpack.c.bf16 %v937_v12, %v933_v10 }
 0x1a2   :  { %v877_v15 = vpack.c.bf16 %v939_v13, %v935_v11  ;;  %v476_v11 = vpop.permute.xlu1 %475 }
 0x1a4   :  { %878 = vmatprep.subr.bf16.mxu1 %v877_v15 }
 0x1a5   :  { %880 = vmatpush1.bf16.msra.mxu1 %v879_v14 }
 0x1a8   :  { %837 = vmatmul.mubr.msk.f32.vlgmr.msra.gmra.mrb[0].mxu1 %vm199_vm0, %v829_v16 }
 0x1a9   :  { %421 = vmatprep.mubr.f32.mxu1 %v1014_v23 }
 0x1ac   :  { %838 = vmatmul.mubr.msk.f32.gmra.mrb[2].mxu1 %vm199_vm0, %v830_v17 }
 0x1ad   :  { %427 = vmatprep.mubr.f32.mxu1 %v1014_v23 }
 0x1b0   :  { %839 = vmatmul.mubr.msk.f32.gmra.mrb[4].mxu1 %vm199_vm0, %v831_v18 }
 0x1b1   :  { %433 = vmatprep.mubr.f32.mxu1 %v1014_v23 }
 0x1b4   :  { %840 = vmatmul.mubr.msk.f32.gmra.mrb[6].mxu1 %vm199_vm0, %v832_v19 }
 0x1b5   :  { %693 = vmatprep.mubr.f32.mxu1 %v1014_v23 }
 0x27b   :  { %v417_v21 = vpop.f32.mrb[0].mxu1 }
 0x27c   :  { %v418_v22 = vadd.f32 %v417_v21, %v322_v20  ;;  %v419_v24 = vpop.f32.mrb[1].mxu1 }
 0x27d   :  { %v420_v25 = vadd.f32 %v419_v24, %v322_v20 }
 0x27e   :  { %940 = vtanh.f32 %v418_v22 }
 0x27f   :  { %v423_v27 = vpop.f32.mrb[2].mxu1  ;;  %942 = vtanh.f32 %v420_v25 }
 0x280   :  { %v424_v28 = vadd.f32 %v423_v27, %v327_v26  ;;  %v425_v29 = vpop.f32.mrb[3].mxu1 }
 0x281   :  { %v426_v30 = vadd.f32 %v425_v29, %v327_v26  ;;  %v853_v29 = vld [vmem:[%s1257_s3 + $0x60] sm:$0xff] }
 0x282   :  { %944 = vtanh.f32 %v424_v28 }
 0x283   :  { %946 = vtanh.f32 %v426_v30  ;;  %v429_v32 = vpop.f32.mrb[4].mxu1  ;;  %v854_v30 = vld [vmem:[%s1257_s3 + $0x68] sm:$0xff] }
 0x284   :  { %v430_v35 = vadd.f32 %v429_v32, %v332_v31  ;;  %v431_v36 = vpop.f32.mrb[5].mxu1  ;;  %v856_v32 = vld [vmem:[%s1257_s3 + $0x78] sm:$0xff] }
 0x285   :  { %v432_v38 = vadd.f32 %v431_v36, %v332_v31  ;;  %v855_v31 = vld [vmem:[%s1257_s3 + $0x70] sm:$0xff]  ;;  %s1016_s3 = smov [#allocation3]  }
 0x286   :  { %948 = vtanh.f32 %v430_v35  ;;  %v600_v35 = vpop.permute.xlu0 %599  ;;  %s817_s6 = sshll.u32 %s1016_s3, 4  ;;  %s818_s6 = int_to_ptr.vmem [resolvable:$true] %s817_s6 }
 0x287   :  { %v435_v40 = vpop.f32.mrb[6].mxu1  ;;  %950 = vtanh.f32 %v432_v38  ;;  %s988_s9 = scalar_lea.vmem %s818_s6, 32  ;;  %p993_p1 = scmp.lt.s32.totalorder %s818_s6, %s818_s6 }
 0x288   :  { %v436_v41 = vadd.f32 %v435_v40, %v337_v39  ;;  %v437_v42 = vpop.f32.mrb[7].mxu1  ;;  %v941_v44 = vpop.eup %940  ;;  %p989_p0 = scmp.ne.s32.totalorder %s818_s6, %s988_s9  ;;  %p994_p2 = scmp.lt.s32.totalorder %s988_s9, %s988_s9 }
 0x289   :  { %v438_v43 = vadd.f32 %v437_v42, %v337_v39  ;;  %v943_v45 = vpop.eup %942 }
 0x28a   :  { %952 = vtanh.f32 %v436_v41  ;;  %v605_v41 = vpop.permute.xlu1 %604  ;;  %p995_p3 = por %p994_p2, %p993_p1 }
 0x28b   :  { %954 = vtanh.f32 %v438_v43 }
 0x28c   :  { %v945_v46 = vpop.eup %944  ;;  %p996_p4 = pnand %p995_p3, %p989_p0 }
 0x28d   :  { %v947_v47 = vpop.eup %946  ;;  %v883_v48 = vpack.c.bf16 %v945_v46, %v941_v44 }
 0x28e   :  { %v881_v49 = vpack.c.bf16 %v947_v47, %v943_v45 }
 0x290   :  { %882 = vmatprep.subr.bf16.mxu0 %v881_v49  ;;  %v949_v50 = vpop.eup %948 }
 0x291   :  { %884 = vmatpush1.bf16.msra.mxu0 %v883_v48  ;;  %v951_v51 = vpop.eup %950 }
 0x294   :  { %v953_v52 = vpop.eup %952 }
 0x295   :  { %v955_v53 = vpop.eup %954  ;;  %v887_v54 = vpack.c.bf16 %v953_v52, %v949_v50  ;;  %v615_v50 = vpop.permute.xlu1 %614 }
 0x296   :  { %v885_v55 = vpack.c.bf16 %v955_v53, %v951_v51 }
 0x298   :  { %886 = vmatprep.subr.bf16.mxu0 %v885_v55 }
 0x299   :  { %888 = vmatpush1.bf16.msra.mxu0 %v887_v54 }
 0x29c   :  { %849 = vmatmul.mubr.msk.f32.vlgmr.msra.gmra.mrb[8].mxu0 %vm199_vm0, %v841_v56 }
 0x29d   :  { %560 = vmatprep.mubr.f32.mxu0 %v1014_v23 }
 0x2a0   :  { %850 = vmatmul.mubr.msk.f32.gmra.mrb[10].mxu0 %vm199_vm0, %v842_v57 }
 0x2a1   :  { %566 = vmatprep.mubr.f32.mxu0 %v1014_v23 }
 0x2a4   :  { %851 = vmatmul.mubr.msk.f32.gmra.mrb[12].mxu0 %vm199_vm0, %v843_v58 }
 0x2a5   :  { %572 = vmatprep.mubr.f32.mxu0 %v1014_v23 }
 0x2a8   :  { %852 = vmatmul.mubr.msk.f32.gmra.mrb[14].mxu0 %vm199_vm0, %v844_v59  ;;  %v738_v59 = vpop.permute.xlu1 %737 }
 0x36f   :  { %v556_v61 = vpop.f32.mrb[8].mxu0 }
 0x370   :  { %v557_v62 = vadd.f32 %v556_v61, %v461_v60  ;;  %v558_v63 = vpop.f32.mrb[9].mxu0 }
 0x371   :  { %v559_v0 = vadd.f32 %v558_v63, %v461_v60 }
 0x372   :  { %956 = vtanh.f32 %v557_v62 }
 0x373   :  { %v562_v2 = vpop.f32.mrb[10].mxu0  ;;  %958 = vtanh.f32 %v559_v0 }
 0x374   :  { %v563_v3 = vadd.f32 %v562_v2, %v466_v1  ;;  %v564_v4 = vpop.f32.mrb[11].mxu0 }
 0x375   :  { %v565_v5 = vadd.f32 %v564_v4, %v466_v1 }
 0x376   :  { %960 = vtanh.f32 %v563_v3 }
 0x377   :  { %962 = vtanh.f32 %v565_v5  ;;  %v568_v7 = vpop.f32.mrb[12].mxu0 }
 0x378   :  { %v569_v8 = vadd.f32 %v568_v7, %v471_v6  ;;  %v570_v9 = vpop.f32.mrb[13].mxu0 }
 0x379   :  { %v571_v10 = vadd.f32 %v570_v9, %v471_v6 }
 0x37a   :  { %964 = vtanh.f32 %v569_v8 }
 0x37b   :  { %v574_v12 = vpop.f32.mrb[14].mxu0  ;;  %966 = vtanh.f32 %v571_v10  ;;  %v748_v10 = vpop.permute.xlu1 %747 }
 0x37c   :  { %v575_v13 = vadd.f32 %v574_v12, %v476_v11  ;;  %v576_v14 = vpop.f32.mrb[15].mxu0  ;;  %v957_v16 = vpop.eup %956 }
 0x37d   :  { %v577_v15 = vadd.f32 %v576_v14, %v476_v11  ;;  %v959_v17 = vpop.eup %958 }
 0x37e   :  { %968 = vtanh.f32 %v575_v13 }
 0x37f   :  { %970 = vtanh.f32 %v577_v15 }
 0x380   :  { %v961_v18 = vpop.eup %960 }
 0x381   :  { %v963_v19 = vpop.eup %962  ;;  %v891_v20 = vpack.c.bf16 %v961_v18, %v957_v16 }
 0x382   :  { %v889_v21 = vpack.c.bf16 %v963_v19, %v959_v17 }
 0x384   :  { %890 = vmatprep.subr.bf16.mxu1 %v889_v21  ;;  %v965_v22 = vpop.eup %964 }
 0x385   :  { %892 = vmatpush1.bf16.msra.mxu1 %v891_v20  ;;  %v967_v24 = vpop.eup %966 }
 0x388   :  { %v969_v25 = vpop.eup %968 }
 0x389   :  { %v971_v26 = vpop.eup %970  ;;  %v895_v27 = vpack.c.bf16 %v969_v25, %v965_v22 }
 0x38a   :  { %v893_v28 = vpack.c.bf16 %v971_v26, %v967_v24  ;;  %v1015_v24 = vmov 1966171168  }
 0x38b   :  { %v792_v25 = vunpack.c.l.s4 %v1015_v24 }
 0x38c   :  { %894 = vmatprep.subr.bf16.mxu1 %v893_v28 }
 0x38d   :  { %896 = vmatpush1.bf16.msra.mxu1 %v895_v27 }
 0x390   :  { %861 = vmatmul.mubr.msk.f32.vlgmr.msra.gmra.mrb[8].mxu1 %vm199_vm0, %v853_v29 }
 0x391   :  { %699 = vmatprep.mubr.f32.mxu1 %v1014_v23 }
 0x394   :  { %862 = vmatmul.mubr.msk.f32.gmra.mrb[10].mxu1 %vm199_vm0, %v854_v30 }
 0x395   :  { %705 = vmatprep.mubr.f32.mxu1 %v1014_v23 }
 0x398   :  { %863 = vmatmul.mubr.msk.f32.gmra.mrb[12].mxu1 %vm199_vm0, %v855_v31  ;;  %v793_v31 = vunpack.c.0.s8 %v792_v25 }
 0x399   :  { %711 = vmatprep.mubr.f32.mxu1 %v1014_v23  ;;  %v610_v23 = vpop.permute.xlu0 %609 }
 0x39c   :  { %864 = vmatmul.mubr.msk.f32.gmra.mrb[14].mxu1 %vm199_vm0, %v856_v32 }
 0x39d   :  { %v733_v56 = vpop.permute.xlu0 %732 }
 0x3a1   :  { %v743_v3 = vpop.permute.xlu0 %742 }
 0x3a5   :  { %v780_v27 = vpop.permute.xlu0 %779 }
 0x3a6   :  { %v785_v32 = vrot.slane %v780_v27, %v1150_v37 }
 0x463   :  { %v695_v36 = vpop.f32.mrb[8].mxu1 }
 0x464   :  { %v696_v38 = vadd.f32 %v695_v36, %v600_v35  ;;  %v697_v39 = vpop.f32.mrb[9].mxu1 }
 0x465   :  { %v698_v40 = vadd.f32 %v697_v39, %v600_v35 }
 0x466   :  { %972 = vtanh.f32 %v696_v38 }
 0x467   :  { %v701_v42 = vpop.f32.mrb[10].mxu1  ;;  %974 = vtanh.f32 %v698_v40  ;;  %v796_v40 = vsub.s32 %v793_v31, %v1147_v34 }
 0x468   :  { %v702_v43 = vadd.f32 %v701_v42, %v605_v41  ;;  %v703_v44 = vpop.f32.mrb[11].mxu1 }
 0x469   :  { %v704_v45 = vadd.f32 %v703_v44, %v605_v41 }
 0x46a   :  { %976 = vtanh.f32 %v702_v43 }
 0x46b   :  { %978 = vtanh.f32 %v704_v45  ;;  %v707_v46 = vpop.f32.mrb[12].mxu1 }
 0x46c   :  { %v708_v47 = vadd.f32 %v707_v46, %v610_v23  ;;  %v709_v48 = vpop.f32.mrb[13].mxu1 }
 0x46d   :  { %v710_v49 = vadd.f32 %v709_v48, %v610_v23 }
 0x46e   :  { %980 = vtanh.f32 %v708_v47 }
 0x46f   :  { %982 = vtanh.f32 %v710_v49  ;;  %v713_v51 = vpop.f32.mrb[14].mxu1 }
 0x470   :  { %v714_v52 = vadd.f32 %v713_v51, %v615_v50  ;;  %v715_v53 = vpop.f32.mrb[15].mxu1  ;;  %v973_v55 = vpop.eup %972 }
 0x471   :  { %v716_v54 = vadd.f32 %v715_v53, %v615_v50  ;;  %v975_v57 = vpop.eup %974  ;;  %v750_v61 = vmul.f32 %v973_v55, %v733_v56 }
 0x472   :  { %984 = vtanh.f32 %v714_v52  ;;  %v751_v63 = vmul.f32 %v975_v57, %v733_v56 }
 0x473   :  { %986 = vtanh.f32 %v716_v54 }
 0x474   :  { %v977_v58 = vpop.eup %976 }
 0x475   :  { %v979_v60 = vpop.eup %978  ;;  %v752_v62 = vmul.f32 %v977_v58, %v738_v59 }
 0x476   :  { %v753_v0 = vmul.f32 %v979_v60, %v738_v59 }
 0x477   :  { %v758_v1 = vadd.f32 %v752_v62, %v750_v61 }
 0x478   :  { %v981_v2 = vpop.eup %980  ;;  %v767_v4 = vadd.f32 %v753_v0, %v751_v63 }
 0x479   :  { %v983_v5 = vpop.eup %982  ;;  %v754_v6 = vmul.f32 %v981_v2, %v743_v3 }
 0x47a   :  { %v755_v7 = vmul.f32 %v983_v5, %v743_v3 }
 0x47b   :  { %v759_v8 = vadd.f32 %v758_v1, %v754_v6 }
 0x47c   :  { %v985_v9 = vpop.eup %984  ;;  %v768_v11 = vadd.f32 %v767_v4, %v755_v7 }
 0x47d   :  { %v987_v12 = vpop.eup %986  ;;  %v756_v13 = vmul.f32 %v985_v9, %v748_v10 }
 0x47e   :  { %v757_v14 = vmul.f32 %v987_v12, %v748_v10 }
 0x47f   :  { %v760_v15 = vadd.f32 %v759_v8, %v756_v13 }
 0x480   :  { %v769_v16 = vadd.f32 %v768_v11, %v757_v14 }
 0x481   :  { %v761_v17 = vrot.slane %v760_v15, 4 }
 0x482   :  { %v770_v18 = vrot.slane %v769_v16, 4 }
 0x483   :  { %v762_v19 = vadd.f32 %v761_v17, %v760_v15 }
 0x484   :  { %v771_v20 = vadd.f32 %v770_v18, %v769_v16 }
 0x485   :  { %v763_v21 = vrot.slane %v762_v19, 2 }
 0x486   :  { %v772_v22 = vrot.slane %v771_v20, 2 }
 0x487   :  { %v764_v26 = vadd.f32 %v763_v21, %v762_v19 }
 0x488   :  { %v773_v28 = vadd.f32 %v772_v22, %v771_v20 }
 0x489   :  { %v765_v29 = vrot.slane %v764_v26, 1 }
 0x48a   :  { %v774_v30 = vrot.slane %v773_v28, 1 }
 0x48b   :  { %v766_v35 = vadd.f32 %v765_v29, %v764_v26 }
 0x48c   :  { %v775_v36 = vadd.f32 %v774_v30, %v773_v28 }
 0x48d   :  { %v786_v38 = vadd.f32 %v785_v32, %v766_v35 }
 0x48e   :  { %v787_v39 = vadd.f32 %v785_v32, %v775_v36 }
 0x490   :  { %v790_v41 = vcombine.low %v786_v38, %v787_v39 }
 0x492   :  { %v797_v42 = vrot.slane %v790_v41, %v796_v40 }
 0x494   :  { %v804_v43 = vrot.slane %v797_v42, %v796_v40 }
 0x496   :  { %810 = vst.msk [vmem:[#allocation3] sm:$0x3] %vm808_vm1, %v804_v43 }
 0x497   :  { %999 = shalt.err (!%p996_p4)
}
 0x498   :  { %s1000_s12 = scalar_lea.hbm %s1261_s7, 32 }
 0x499   :  { %p1001_p5 = scmp.ne.s32.totalorder %s1261_s7, %s1000_s12  ;;  %p1004_p6 = scmp.lt.u32.totalorder %s1000_s12, %s1261_s7 }
 0x49b   :  { %p1006_p7 = pnand %p1004_p6, %p1001_p5 }
 0x49d   :  { %1009 = shalt.err (!%p1006_p7)
}
 0x49e   :  { %820 = dma.vmem_to_hbm [thread:$0]  %s818_s6, 32, %s1261_s7, [#allocation4]  }
 0x49f   :  { %1010 = dma.done.wait [#allocation4], 32  }
 0x4a0   :  { %1011 = vsyncadd [#allocation4], 4294967264 }
 0x4a1   :  { %824 = vsyncpa [#allocation4], 1 }

</bundles_post_ra>
